<compile_context>
chip_gen: v7x
topology: tpu7x:2x2x1
jax: 0.10.0
libtpu: 0.0.40
codegen_flags: <defaults>
</compile_context>

<pallas_src>
import math

import jax
import jax.numpy as jnp
from jax.experimental import pallas as pl
from jax.experimental.pallas import tpu as pltpu


# ---------------------------------------------------------------------------
# Kernels
# ---------------------------------------------------------------------------

def _pe_add_folded_kernel(x_ref, pe_ref, o_ref):
    # x_ref / o_ref: (B, d_model, tile_T); pe_ref: (1, d_model, tile_T).
    # The leading size-1 dim of pe broadcasts over the batch axis (pure VPU add).
    o_ref[...] = x_ref[...] + pe_ref[...]


def _pe_add_perbatch_kernel(x_ref, pe_ref, o_ref):
    # All refs: (d_model, tile_T); leading size-1 dims squeezed away by BlockSpec.
    o_ref[...] = x_ref[...] + pe_ref[...]


# ---------------------------------------------------------------------------
# Tile / VMEM sizing
# ---------------------------------------------------------------------------

def _per_step_budget_bytes():
    """Bytes for all blocks of ONE pipeline step (x + pe + out, single buffer).

    Double-buffering means the real footprint is ~2x this; 12 MiB keeps the
    doubled footprint (+headroom) under the 32 MiB scoped default on v7x
    (64 MiB physical) and trivially inside v5e/v6e once we raise the scoped
    limit explicitly.
    """
    try:
        vmem = getattr(pltpu.get_tpu_info(), "vmem_capacity_bytes", 64 << 20)
    except Exception:  # pragma: no cover - conservative fallback off-TPU
        vmem = 64 << 20
    return int(min(12 << 20, vmem // 5))


def _vmem_limit_bytes(step_bytes):
    # Double-buffered blocks + headroom, clamped so the request is legal on
    # every generation (v7x: 64 MiB physical VMEM, 32 MiB scoped default).
    return int(min(max(2 * step_bytes + (4 << 20), 16 << 20), 32 << 20))


def _choose_tile_t(T, bytes_per_col, budget):
    """Largest lane-dense (multiple-of-128) time tile fitting the VMEM budget.

    For T >= 256 the tile is additionally capped at ~T/2 so the grid has at
    least 2 time steps: that lets v7x shard the 'parallel' axis across both
    TensorCores and costs only ~0.35us of extra per-step overhead.
    """
    by_vmem = max(128, (budget // bytes_per_col) // 128 * 128)
    by_seq = (T // 128) * 128          # never exceed the array's own extent
    tile = min(by_vmem, by_seq)
    if T >= 256:
        half = pl.cdiv(pl.cdiv(T, 2), 128) * 128
        tile = min(tile, max(128, half))
    return int(tile)


# ---------------------------------------------------------------------------
# pallas_call wrappers
# ---------------------------------------------------------------------------

def _cost_estimate(B, d_model, T, itemsize):
    return pl.CostEstimate(
        flops=B * d_model * T,
        transcendentals=0,
        bytes_accessed=(2 * B * d_model * T + d_model * T) * itemsize,
    )


def _pe_add_folded(x, pe, tile_T, donate_x):
    B, d_model, T = x.shape
    grid_t = pl.cdiv(T, tile_T)
    itemsize = x.dtype.itemsize
    step_bytes = (2 * B + 1) * d_model * tile_T * itemsize
    return pl.pallas_call(
        _pe_add_folded_kernel,
        out_shape=jax.ShapeDtypeStruct((B, d_model, T), x.dtype),
        grid_spec=pltpu.PrefetchScalarGridSpec(
            num_scalar_prefetch=0,
            grid=(grid_t,),
            in_specs=[
                pl.BlockSpec((B, d_model, tile_T), lambda t: (0, 0, t)),
                # Full pe passed in; the needed columns are selected purely via
                # the time-block index t (no wrapper-side slice / extra HBM pass).
                # Invariant: pe's last-dim extent >= T, so every column the
                # masked output write keeps corresponds to a valid pe column;
                # the trailing-tile overhang past T is either still inside
                # max_len or a masked partial block.
                pl.BlockSpec((1, d_model, tile_T), lambda t: (0, 0, t)),
            ],
            out_specs=pl.BlockSpec((B, d_model, tile_T), lambda t: (0, 0, t)),
        ),
        compiler_params=pltpu.CompilerParams(
            dimension_semantics=("parallel",),
            vmem_limit_bytes=_vmem_limit_bytes(step_bytes),
        ),
        cost_estimate=_cost_estimate(B, d_model, T, itemsize),
        input_output_aliases={0: 0} if donate_x else {},
    )(x, pe)


def _pe_add_perbatch(x, pe, tile_T, donate_x):
    # Fallback when B * d_model is too large to fold the whole batch into one
    # block.  B is innermost so the pe block index (0, 0, t) repeats across
    # consecutive grid steps and Pallas skips re-fetching the pe tile.
    B, d_model, T = x.shape
    grid_t = pl.cdiv(T, tile_T)
    itemsize = x.dtype.itemsize
    step_bytes = 3 * d_model * tile_T * itemsize
    return pl.pallas_call(
        _pe_add_perbatch_kernel,
        out_shape=jax.ShapeDtypeStruct((B, d_model, T), x.dtype),
        grid_spec=pltpu.PrefetchScalarGridSpec(
            num_scalar_prefetch=0,
            grid=(grid_t, B),
            in_specs=[
                pl.BlockSpec((None, d_model, tile_T), lambda t, b: (b, 0, t)),
                pl.BlockSpec((None, d_model, tile_T), lambda t, b: (0, 0, t)),
            ],
            out_specs=pl.BlockSpec((None, d_model, tile_T), lambda t, b: (b, 0, t)),
        ),
        compiler_params=pltpu.CompilerParams(
            dimension_semantics=("parallel", "parallel"),
            vmem_limit_bytes=_vmem_limit_bytes(step_bytes),
        ),
        cost_estimate=_cost_estimate(B, d_model, T, itemsize),
        input_output_aliases={0: 0} if donate_x else {},
    )(x, pe)


def positional_encoding_add(x, pe, *, donate_x=False):
    """Forward pass of _PositionalEncoding: x + pe[:, :, :T].

    x:  (B, d_model, T)
    pe: (1, d_model, max_len) with max_len >= T.
    donate_x: alias x's HBM buffer as the output (only if the caller does not
              reuse x afterwards).
    """
    B, d_model, T = x.shape
    assert pe.ndim == 3 and pe.shape[0] == 1 and pe.shape[1] == d_model and pe.shape[2] >= T
    if pe.dtype != x.dtype:
        # Correctness guard only.  Build pe in the activation dtype at init
        # (make_positional_encoding(dtype=...)) so this full (1, d_model,
        # max_len) cast never runs in the hot path.
        pe = pe.astype(x.dtype)

    if T < 128:
        # Sub-128 lane widths force masked partial stores and the launch/DMA
        # overhead dominates; a fused XLA elementwise add is cheaper here.
        return x + pe[:, :, :T]

    itemsize = x.dtype.itemsize
    budget = _per_step_budget_bytes()

    folded_bytes_per_col = (2 * B + 1) * d_model * itemsize
    if folded_bytes_per_col * 128 <= budget:
        tile_T = _choose_tile_t(T, folded_bytes_per_col, budget)
        return _pe_add_folded(x, pe, tile_T, donate_x)

    tile_T = _choose_tile_t(T, 3 * d_model * itemsize, budget)
    return _pe_add_perbatch(x, pe, tile_T, donate_x)


# ---------------------------------------------------------------------------
# Parameter init (mirrors the PyTorch __init__ exactly)
# ---------------------------------------------------------------------------

def make_positional_encoding(d_model, max_len=10000, dtype=jnp.float32):
    """Deterministic pe init, shape (1, d_model, max_len), in the model dtype."""
    assert d_model % 2 == 0, "d_model must be even (same constraint as the PyTorch reference)"
    position = jnp.arange(0, max_len, dtype=jnp.float32)[:, None]             # (max_len, 1)
    div_term = jnp.exp(
        jnp.arange(0, d_model, 2, dtype=jnp.float32) * -(math.log(10000.0) / d_model)
    )                                                                          # (d_model//2,)
    angles = position * div_term                                               # (max_len, d_model//2)
    pe = jnp.zeros((max_len, d_model), dtype=jnp.float32)
    pe = pe.at[:, 0::2].set(jnp.sin(angles))
    pe = pe.at[:, 1::2].set(jnp.cos(angles))
    pe = pe[None, :, :].transpose(0, 2, 1)                                     # (1, d_model, max_len)
    return pe.astype(dtype)


# ---------------------------------------------------------------------------
# Self-test
# ---------------------------------------------------------------------------

if __name__ == "__main__":
    key = jax.random.PRNGKey(0)
    k1, k2, k3 = jax.random.split(key, 3)

    B, d_model, max_len = 2, 32, 2048
    pe = make_positional_encoding(d_model, max_len=max_len, dtype=jnp.float32)

    # Main case: batch-folded tiled path, T a multiple of 128 (>= 2 time tiles).
    T = 512
    x = jax.random.normal(k1, (B, d_model, T), dtype=jnp.float32)
    out = jax.block_until_ready(positional_encoding_add(x, pe))
    ref = x + pe[:, :, :T]
    assert out.shape == (B, d_model, T)
    assert jnp.allclose(out, ref, atol=1e-6), "mismatch vs reference (folded tiled path)"

    # Ragged case: T not a multiple of 128 -> masked partial last time tile.
    Tr = 320
    xr = jax.random.normal(k2, (B, d_model, Tr), dtype=jnp.float32)
    outr = jax.block_until_ready(positional_encoding_add(xr, pe))
    refr = xr + pe[:, :, :Tr]
    assert outr.shape == (B, d_model, Tr)
    assert jnp.allclose(outr, refr, atol=1e-6), "mismatch vs reference (partial tile path)"

    # Small-T path (T < 128): plain fused jnp add.
    Ts = 16
    xs = jax.random.normal(k3, (B, d_model, Ts), dtype=jnp.float32)
    outs = jax.block_until_ready(positional_encoding_add(xs, pe))
    refs = xs + pe[:, :, :Ts]
    assert outs.shape == (B, d_model, Ts)
    assert jnp.allclose(outs, refs, atol=1e-6), "mismatch vs reference (small path)"

    print("KERNEL_OK")
</pallas_src>

<mosaic_0001>
module attributes {stable_mosaic.version = 11 : i64} {
  func.func @_pe_add_folded_kernel(%arg0: i32, %arg1: memref<2x32x256xf32, #tpu.memory_space<vmem>>, %arg2: memref<1x32x256xf32, #tpu.memory_space<vmem>>, %arg3: memref<2x32x256xf32, #tpu.memory_space<vmem>>) attributes {dimension_semantics = [#tpu.dimension_semantics<parallel>], iteration_bounds = array<i64: 2>, scalar_prefetch = 0 : i64, scratch_operands = 0 : i64, tpu.core_type = #tpu.core_type<tc>, window_params = [{transform_indices = @transform_0, window_bounds = array<i64: 2, 32, 256>}, {transform_indices = @transform_1, window_bounds = array<i64: 1, 32, 256>}, {transform_indices = @transform_2, window_bounds = array<i64: 2, 32, 256>}]} {
    %c0 = arith.constant 0 : index
    %c0_0 = arith.constant 0 : index
    %c0_1 = arith.constant 0 : index
    %0 = vector.load %arg1[%c0, %c0_0, %c0_1] : memref<2x32x256xf32, #tpu.memory_space<vmem>>, vector<2x32x256xf32>
    %c0_2 = arith.constant 0 : index
    %c0_3 = arith.constant 0 : index
    %c0_4 = arith.constant 0 : index
    %1 = vector.load %arg2[%c0_2, %c0_3, %c0_4] : memref<1x32x256xf32, #tpu.memory_space<vmem>>, vector<1x32x256xf32>
    %2 = vector.broadcast %1 : vector<1x32x256xf32> to vector<2x32x256xf32>
    %3 = arith.addf %0, %2 : vector<2x32x256xf32>
    %c0_5 = arith.constant 0 : index
    %c0_6 = arith.constant 0 : index
    %c0_7 = arith.constant 0 : index
    %4 = vector.load %arg3[%c0_5, %c0_6, %c0_7] : memref<2x32x256xf32, #tpu.memory_space<vmem>>, vector<2x32x256xf32>
    tpu.vector_store %arg3[%c0_5, %c0_6, %c0_7], %3 {strides = array<i32>} : memref<2x32x256xf32, #tpu.memory_space<vmem>>, vector<2x32x256xf32>,
    return
  }
  func.func @transform_0(%arg0: i32) -> (i32, i32, i32) {
    %c0_i32 = arith.constant 0 : i32
    %c0_i32_0 = arith.constant 0 : i32
    %c0_i32_1 = arith.constant 0 : i32
    return %c0_i32, %c0_i32_0, %arg0 : i32, i32, i32
  }
  func.func @transform_1(%arg0: i32) -> (i32, i32, i32) {
    %c0_i32 = arith.constant 0 : i32
    %c0_i32_0 = arith.constant 0 : i32
    %c0_i32_1 = arith.constant 0 : i32
    return %c0_i32, %c0_i32_0, %arg0 : i32, i32, i32
  }
  func.func @transform_2(%arg0: i32) -> (i32, i32, i32) {
    %c0_i32 = arith.constant 0 : i32
    %c0_i32_0 = arith.constant 0 : i32
    %c0_i32_1 = arith.constant 0 : i32
    return %c0_i32, %c0_i32_0, %arg0 : i32, i32, i32
  }
}

</mosaic_0001>

<bundles_post_ra>
// kernel: tpu_custom_call.1
= control target key start
LH: loop header
LB: loop body
LE: loop exit
PB: predicated region body
PF: predicated region fallthrough
CT: control target
= control target key end

     0   :  { %7 = vsyncpa [#allocation3], 0  ;;  %s875_s0 = inlined_call_operand.hbm [shape: f32[2,32,512], index: 0, kind: input, shape index: {}]   ;;  %s876_s1 = inlined_call_operand.hbm [shape: f32[1,32,2048], index: 1, kind: input, shape index: {}]   ;;  %s877_s2 = inlined_call_operand.hbm [shape: f32[2,32,512], index: 2, kind: output, shape index: {}]  }
   0x1   :  { %9 = vsyncpa [#allocation3 + $0x1], 0 }
   0x2   :  { %10 = vsyncpa [#allocation6], 0 }
   0x3   :  { %12 = vsyncpa [#allocation6 + $0x1], 0 }
   0x4   :  { %13 = vsyncpa [#allocation4], 0 }
   0x5   :  { %15 = vsyncpa [#allocation4 + $0x1], 0  ;;  %s607_s9 = smov 0   ;;  %s609_s10 = smov 0  }
   0x6   :  { %s611_s11 = smov 0   ;;  %s613_s12 = smov 0  }
   0x7 LB: > { %s628_s13 = sadd.s32 4294967295, %s580_s12   ;;  %s371_s14 = sadd.s32 4294967294, %s580_s12   ;;  %s580_s12 = sphi %s613_s12, %s894_s12   ;;  %s576_s11 = sphi %s611_s11, %s893_s11   ;;  %s572_s10 = sphi %s609_s10, %s892_s10   ;;  %s568_s9 = sphi %s607_s9, %s891_s9  }
   0x8   : > { %s632_s15 = sadd.s32 1, %s580_s12   ;;  %s28_s16 = sadd.s32 1, %s576_s11 }
   0x9   : > { %s25_s17 = ssub.s32 %s580_s12, %s632_s15  ;;  %p35_p0 = scmp.ne.s32.totalorder %s576_s11, %s572_s10 }
   0xa   : > { %p26_p1 = scmp.eq.s32.totalorder %s25_s17, 0  ;;  %p36_p2 = scmp.eq.s32.totalorder %s580_s12, 0 }
   0xb   : > { %p41_p3 = scmp.ne.s32.totalorder %s572_s10, %s568_s9  ;;  %p42_p4 = scmp.eq.s32.totalorder %s628_s13, 0 }
   0xc   : > { %s644_s18 = scalar_select %p26_p1, %s576_s11, %s28_s16  }
   0xd   : > { %p646_p5 = por %p36_p2, %p35_p0  ;;  %p650_p6 = por %p42_p4, %p41_p3 }
   0xe   : > { %p91_p7 = scmp.eq.s32.totalorder %s628_s13, 1  ;;  %p97_p8 = scmp.eq.s32.totalorder %s371_s14, 1 }
   0xf   : > { %s881_s20 = scalar_select %p650_p6, 1, 0 }
  0x10   : > { %p409_p10 = scmp.lt.s32.totalorder %s580_s12, 2  ;;  %p657_p11 = por %p91_p7, %p35_p0 }
  0x11   : > { %p661_p12 = por %p97_p8, %p41_p3  ;;  %s666_s23 = sand.u32 1, %s576_s11  }
  0x12   : > { %s882_s21 = scalar_select %p657_p11, 1, 0 }
  0x13   : > { %s883_s22 = scalar_select %p661_p12, 1, 0 }
  0x14   : > { %s389_s24 = sshll.u32 %s580_s12, 8  ;;  %s374_s25 = sshll.u32 %s666_s23, 7 }
  0x15   : > { %s675_s28 = scalar_lea.hbm %s875_s0, %s389_s24  ;;  %s121_s29 = scalar_lea.vmem [#allocation2], %s374_s25 }
  0x16   : > { %s128_s30 = sshll.u32 %s121_s29, 4  ;;  %p679_p13 = pnand %p409_p10, %p646_p5  ;;  %s683_s30 = int_to_ptr.vmem [resolvable:$true] %s128_s30 }
  0x17   : > { %s118_s4 = scalar_lea.sflag [#allocation3], %s666_s23  ;;  %s450_s5 = scalar_lea.hbm %s675_s28, 2048 }
  0x18   : > { %p451_p1 = scmp.ne.s32.totalorder %s675_s28, %s450_s5  ;;  %p452_p2 = pneg %p679_p13 }
  0x19   : > { %s455_s8 = scalar_lea.hbm %s875_s0, 4096  ;;  %p456_p5 = scmp.lt.u32.totalorder %s675_s28, %s875_s0 }
  0x1a   : > { %p453_p3 = pnand %p452_p2, %p451_p1  ;;  %p457_p7 = scmp.lt.u32.totalorder %s455_s8, %s450_s5 }
  0x1b   : > { %p459_p10 = scmp.lt.u32.totalorder %s450_s5, %s675_s28 }
  0x1c   : > { %p454_p4 = pneg %p453_p3  ;;  %p458_p8 = por %p457_p7, %p456_p5 }
  0x1e   : > { %p460_p9 = por %p459_p10, %p458_p8 }
  0x20   : > { %p461_p0 = pnand %p460_p9, %p454_p4 }
  0x22   : > { %464 = shalt.err (!%p461_p0)
}
  0x23   : > { %s465_s17 = scalar_lea.vmem %s683_s30, 2048  ;;  %s582_s19 = smov [#allocation2]  }
  0x24   : > { %p466_p1 = scmp.ne.s32.totalorder %s683_s30, %s465_s17  ;;  %s470_s25 = sshll.u32 %s582_s19, 4  ;;  %s471_s25 = int_to_ptr.vmem [resolvable:$false] %s470_s25 }
  0x25   : > { %s472_s26 = scalar_lea.vmem %s471_s25, 4096  ;;  %p473_p11 = scmp.lt.s32.totalorder %s683_s30, %s471_s25 }
  0x26   : > { %p468_p3 = pnand %p466_p1, %p452_p2  ;;  %p474_p5 = scmp.lt.s32.totalorder %s472_s26, %s465_s17 }
  0x28   : > { %p469_p12 = pneg %p468_p3  ;;  %p475_p7 = por %p474_p5, %p473_p11 }
  0x2a   : > { %p476_p8 = pnand %p475_p7, %p469_p12 }
  0x2c   : > { %479 = shalt.err (!%p476_p8)
}
  0x2d   : > { %s583_s27 = smov 512   ;;  %s584_s29 = smov 256  }
  0x2e   : > { %s585_s5 = smov 16   ;;  %p157_p9 = scmp.lt.s32.totalorder %s580_s12, 3 }
  0x2f   : > { %401 = dma.hbm_to_vmem [thread:$0]  (!%p679_p13), %s675_s28, 2048, %s683_s30, %s118_s4, %s583_s27, %s584_s29, %s585_s5  }
  0x30   : > { %s377_s6 = sshll.u32 %s666_s23, 6  ;;  %s723_s14 = scalar_lea.hbm %s876_s1, %s389_s24 }
  0x31   : > { %p885_p11 = scmp.ge.s32.totalorder %s580_s12, 1  ;;  %s142_s17 = scalar_lea.vmem [#allocation5], %s377_s6 }
  0x32   : > { %s149_s19 = sshll.u32 %s142_s17, 4  ;;  %s139_s28 = scalar_lea.sflag [#allocation6], %s666_s23  ;;  %s731_s19 = int_to_ptr.vmem [resolvable:$true] %s149_s19 }
  0x33   : > { %p727_p12 = pnand %p885_p11, %p157_p9  ;;  %s480_s30 = scalar_lea.hbm %s723_s14, 1024 }
  0x34   : > { %p481_p0 = scmp.ne.s32.totalorder %s723_s14, %s480_s30  ;;  %s485_s25 = scalar_lea.hbm %s876_s1, 8192 }
  0x35   : > { %p486_p1 = scmp.lt.u32.totalorder %s723_s14, %s876_s1  ;;  %p487_p3 = scmp.lt.u32.totalorder %s485_s25, %s480_s30 }
  0x36   : > { %p483_p4 = pnand %p481_p0, %p452_p2  ;;  %p489_p7 = scmp.lt.u32.totalorder %s480_s30, %s723_s14 }
  0x37   : > { %p488_p5 = por %p487_p3, %p486_p1 }
  0x38   : > { %p484_p10 = pneg %p483_p4 }
  0x39   : > { %p490_p8 = por %p489_p7, %p488_p5 }
  0x3b   : > { %p491_p9 = pnand %p490_p8, %p484_p10 }
  0x3d   : > { %494 = shalt.err (!%p491_p9)
}
  0x3e   : > { %s495_s6 = scalar_lea.vmem %s731_s19, 1024  ;;  %s586_s7 = smov [#allocation5]  }
  0x3f   : > { %p496_p11 = scmp.ne.s32.totalorder %s731_s19, %s495_s6  ;;  %s500_s8 = sshll.u32 %s586_s7, 4  ;;  %s501_s8 = int_to_ptr.vmem [resolvable:$false] %s500_s8 }
  0x40   : > { %s502_s17 = scalar_lea.vmem %s501_s8, 2048  ;;  %p503_p6 = scmp.lt.s32.totalorder %s731_s19, %s501_s8 }
  0x41   : > { %p498_p0 = pnand %p496_p11, %p452_p2  ;;  %p504_p1 = scmp.lt.s32.totalorder %s502_s17, %s495_s6 }
  0x43   : > { %p499_p4 = pneg %p498_p0  ;;  %p505_p3 = por %p504_p1, %p503_p6 }
  0x45   : > { %p506_p5 = pnand %p505_p3, %p499_p4 }
  0x47   : > { %509 = shalt.err (!%p506_p5)
}
  0x48   : > { %s587_s30 = smov 2048   ;;  %161 = sbr.rel (%p727_p12) target bundleno = 112 (0x70), region = 28 }
  0x49   : > { %404 = dma.hbm_to_vmem [thread:$0]  (!%p679_p13), %s723_s14, 1024, %s731_s19, %s139_s28, %s587_s30, %s584_s29, %s585_s5  }
  0x4a   : > { %s764_s24 = sand.u32 (!%p727_p12), 1, %s572_s10   ;;  %p887_p6 = scmp.ne.s32.totalorder (!%p727_p12), %s881_s20, 0 }
  0x4b   : > { %s381_s4 = sshll.u32 (!%p727_p12), %s764_s24, 7  ;;  %s164_s25 = scalar_lea.sflag (!%p727_p12), [#allocation3], %s764_s24 }
  0x4c   : > { %s768_s26 = scalar_lea.vmem (!%p727_p12), [#allocation2], %s381_s4 }
  0x4f   : > { %555 = dma.done.wait (%p887_p6), %s164_s25, 2048  }
  0x50   : > { %557 = vsyncadd (%p887_p6), %s164_s25, 4294965248  ;;  %s382_s23 = sshll.u32 %s764_s24, 6  ;;  %s173_s3 = scalar_lea.sflag [#allocation6], %s764_s24 }
  0x51   : > { %s776_s29 = scalar_lea.vmem [#allocation5], %s382_s23 }
  0x52   : > { %559 = dma.done.wait (%p887_p6), %s173_s3, 1024  }
  0x53   : > { %561 = vsyncadd (%p887_p6), %s173_s3, 4294966272  ;;  %v205_v0 = vld [vmem:[%s768_s26] sm:$0xff]  ;;  %v206_v2 = vld [vmem:[%s768_s26 + $0x8] sm:$0xff]  ;;  %s791_s20 = scalar_lea.vmem [#allocation7], %s381_s4  ;;  %s391_s5 = sshll.u32 %s628_s13, 8 }
  0x54   : > { %v221_v1 = vld [vmem:[%s776_s29] sm:$0xff]  ;;  %v222_v4 = vld [vmem:[%s776_s29 + $0x8] sm:$0xff]  ;;  %v207_v5 = vld [vmem:[%s768_s26 + $0x10] sm:$0xff]  ;;  %s275_s14 = sshll.u32 %s791_s20, 4  ;;  %s816_s19 = scalar_lea.hbm %s877_s2, %s391_s5  ;;  %s822_s14 = int_to_ptr.vmem [resolvable:$true] %s275_s14 }
  0x55   : > { %v229_v3 = vadd.f32 %v221_v1, %v205_v0  ;;  %v223_v6 = vld [vmem:[%s776_s29 + $0x10] sm:$0xff]  ;;  %v230_v7 = vadd.f32 %v222_v4, %v206_v2  ;;  %v208_v9 = vld [vmem:[%s768_s26 + $0x18] sm:$0xff]  ;;  %v209_v11 = vld [vmem:[%s768_s26 + $0x20] sm:$0xff]  ;;  %s262_s28 = scalar_lea.sflag [#allocation4], %s764_s24  ;;  %s510_s27 = scalar_lea.vmem %s822_s14, 2048 }
  0x56   : > { %v231_v8 = vadd.f32 %v223_v6, %v207_v5  ;;  %v224_v10 = vld [vmem:[%s776_s29 + $0x18] sm:$0xff]  ;;  %v225_v13 = vld [vmem:[%s776_s29 + $0x20] sm:$0xff]  ;;  %v210_v14 = vld [vmem:[%s768_s26 + $0x28] sm:$0xff]  ;;  %p511_p13 = scmp.ne.s32.totalorder %s822_s14, %s510_s27  ;;  %p888_p2 = scmp.ne.s32.totalorder %s882_s21, 0 }
  0x57   : > { %245 = vst [vmem:[%s791_s20] sm:$0xff] %v229_v3  ;;  %v232_v12 = vadd.f32 %v224_v10, %v208_v9  ;;  %v226_v15 = vld [vmem:[%s776_s29 + $0x28] sm:$0xff]  ;;  %246 = vst [vmem:[%s791_s20 + $0x8] sm:$0xff] %v230_v7  ;;  %v233_v16 = vadd.f32 %v225_v13, %v209_v11  ;;  %v211_v18 = vld [vmem:[%s768_s26 + $0x30] sm:$0xff]  ;;  %s588_s6 = smov [#allocation7]  }
  0x58   : > { %247 = vst [vmem:[%s791_s20 + $0x10] sm:$0xff] %v231_v8  ;;  %v234_v17 = vadd.f32 %v226_v15, %v210_v14  ;;  %v227_v19 = vld [vmem:[%s776_s29 + $0x30] sm:$0xff]  ;;  %v212_v20 = vld [vmem:[%s768_s26 + $0x38] sm:$0xff]  ;;  %v213_v23 = vld [vmem:[%s768_s26 + $0x40] sm:$0xff]  ;;  %p512_p12 = pnand %p511_p13, %p888_p2  ;;  %s514_s7 = sshll.u32 %s588_s6, 4  ;;  %s515_s7 = int_to_ptr.vmem [resolvable:$false] %s514_s7 }
  0x59   : > { %248 = vst [vmem:[%s791_s20 + $0x18] sm:$0xff] %v232_v12  ;;  %v235_v21 = vadd.f32 %v227_v19, %v211_v18  ;;  %v228_v22 = vld [vmem:[%s776_s29 + $0x38] sm:$0xff]  ;;  %v214_v24 = vld [vmem:[%s768_s26 + $0x48] sm:$0xff]  ;;  %249 = vst [vmem:[%s791_s20 + $0x20] sm:$0xff] %v233_v16  ;;  %v237_v26 = vadd.f32 %v221_v1, %v213_v23  ;;  %s516_s8 = scalar_lea.vmem %s515_s7, 4096  ;;  %p517_p7 = scmp.lt.s32.totalorder %s822_s14, %s515_s7 }
  0x5a   : > { %250 = vst [vmem:[%s791_s20 + $0x28] sm:$0xff] %v234_v17  ;;  %v236_v25 = vadd.f32 %v228_v22, %v212_v20  ;;  %v238_v27 = vadd.f32 %v222_v4, %v214_v24  ;;  %v215_v28 = vld [vmem:[%s768_s26 + $0x50] sm:$0xff]  ;;  %v216_v29 = vld [vmem:[%s768_s26 + $0x58] sm:$0xff]  ;;  %v217_v30 = vld [vmem:[%s768_s26 + $0x60] sm:$0xff]  ;;  %p513_p10 = pneg %p512_p12  ;;  %p518_p8 = scmp.lt.s32.totalorder %s516_s8, %s510_s27 }
  0x5b   : > { %251 = vst [vmem:[%s791_s20 + $0x30] sm:$0xff] %v235_v21  ;;  %v239_v31 = vadd.f32 %v223_v6, %v215_v28  ;;  %v240_v32 = vadd.f32 %v224_v10, %v216_v29  ;;  %v241_v33 = vadd.f32 %v225_v13, %v217_v30  ;;  %v218_v34 = vld [vmem:[%s768_s26 + $0x68] sm:$0xff]  ;;  %v219_v35 = vld [vmem:[%s768_s26 + $0x70] sm:$0xff]  ;;  %v220_v36 = vld [vmem:[%s768_s26 + $0x78] sm:$0xff] }
  0x5c   : > { %252 = vst [vmem:[%s791_s20 + $0x38] sm:$0xff] %v236_v25  ;;  %253 = vst [vmem:[%s791_s20 + $0x40] sm:$0xff] %v237_v26  ;;  %v242_v37 = vadd.f32 %v226_v15, %v218_v34  ;;  %v243_v38 = vadd.f32 %v227_v19, %v219_v35  ;;  %v244_v39 = vadd.f32 %v228_v22, %v220_v36  ;;  %p519_p9 = por %p518_p8, %p517_p7 }
  0x5d   : > { %254 = vst [vmem:[%s791_s20 + $0x48] sm:$0xff] %v238_v27  ;;  %255 = vst [vmem:[%s791_s20 + $0x50] sm:$0xff] %v239_v31 }
  0x5e   : > { %256 = vst [vmem:[%s791_s20 + $0x58] sm:$0xff] %v240_v32  ;;  %257 = vst [vmem:[%s791_s20 + $0x60] sm:$0xff] %v241_v33  ;;  %p520_p11 = pnand %p519_p9, %p513_p10 }
  0x5f   : > { %258 = vst [vmem:[%s791_s20 + $0x68] sm:$0xff] %v242_v37  ;;  %259 = vst [vmem:[%s791_s20 + $0x70] sm:$0xff] %v243_v38 }
  0x60   : > { %260 = vst [vmem:[%s791_s20 + $0x78] sm:$0xff] %v244_v39 }
  0x61   : > { %523 = shalt.err (!%p520_p11)
}
  0x62   : > { %s524_s17 = scalar_lea.hbm %s816_s19, 2048  ;;  %s528_s25 = scalar_lea.hbm %s877_s2, 4096 }
  0x63   : > { %p525_p0 = scmp.ne.s32.totalorder %s816_s19, %s524_s17  ;;  %p529_p3 = scmp.lt.u32.totalorder %s816_s19, %s877_s2 }
  0x64   : > { %p530_p5 = scmp.lt.u32.totalorder %s528_s25, %s524_s17  ;;  %p532_p13 = scmp.lt.u32.totalorder %s524_s17, %s816_s19 }
  0x65   : > { %p526_p4 = pnand %p525_p0, %p888_p2 }
  0x66   : > { %p531_p6 = por %p530_p5, %p529_p3 }
  0x67   : > { %p527_p1 = pneg %p526_p4 }
  0x68   : > { %p533_p12 = por %p532_p13, %p531_p6 }
  0x6a   : > { %p534_p10 = pnand %p533_p12, %p527_p1 }
  0x6c   : > { %537 = shalt.err (!%p534_p10)
}
  0x6d   : > { %s589_s3 = smov 256   ;;  %s590_s29 = smov 512  }
  0x6e   : > { %s591_s20 = smov 16  }
  0x6f   : > { %396 = dma.vmem_to_hbm [thread:$0]  (%p888_p2), %s822_s14, 2048, %s816_s19, %s262_s28, %s589_s3, %s590_s29, %s591_s20  }
  0x70 PF: > { %s290_s5 = sand.u32 1, %s568_s9   ;;  %p889_p7 = scmp.ne.s32.totalorder %s883_s22, 0 }
  0x71   : > { %p890_p8 = scmp.ge.s32.totalorder %s580_s12, 2  ;;  %s291_s13 = scalar_lea.sflag [#allocation4], %s290_s5 }
  0x73   : > { %p406_p9 = pnand %p890_p8, %p889_p7 }
  0x75   : > { %563 = dma.done.wait (!%p406_p9), %s291_s13, 2048  }
  0x76   : > { %565 = vsyncadd (!%p406_p9), %s291_s13, 4294965248  ;;  %p18_p11 = scmp.ge.s32.totalorder %s632_s15, 4   ;;  %s891_s9 = smov %s572_s10 }
  0x77   : > { %s892_s10 = smov %s576_s11  ;;  %s893_s11 = smov %s644_s18 }
  0x78   : > { %s894_s12 = smov %s632_s15  ;;  %20 = sbr.rel (!%p18_p11) target bundleno = 7 (0x7), region = 86 }
  0x7f   :  { %296 = vsyncpa [#allocation3], 1 }
  0x80   :  { %298 = vsyncpa [#allocation3 + $0x1], 1 }
  0x81   :  { %299 = vsyncpa [#allocation6], 1 }
  0x82   :  { %301 = vsyncpa [#allocation6 + $0x1], 1 }
  0x83   :  { %302 = vsyncpa [#allocation4], 1 }
  0x84   :  { %304 = vsyncpa [#allocation4 + $0x1], 1 }

</bundles_post_ra>
